<compile_context>
chip_gen: v7x
topology: tpu7x:2x2x1
jax: 0.10.0
libtpu: 0.0.40
codegen_flags: <defaults>
</compile_context>

<pallas_src>
import jax
import jax.numpy as jnp
import numpy as np
from jax.experimental import pallas as pl
from jax.experimental.pallas import tpu as pltpu


def _round_up(x: int, m: int) -> int:
    return ((x + m - 1) // m) * m


def _mlp_kernel(x_ref, w_ref, b_ref, o_ref, acc_ref):
    """out = tanh(x @ W + b), accumulated over the K grid axis (axis 2)."""
    k = pl.program_id(2)

    @pl.when(k == 0)
    def _init():
        acc_ref[...] = jnp.zeros_like(acc_ref)

    acc_ref[...] += jnp.dot(
        x_ref[...], w_ref[...], preferred_element_type=jnp.float32
    )

    @pl.when(k == pl.num_programs(2) - 1)
    def _finalize():
        # Bias add + tanh fused into the epilogue (runs once per output tile).
        o_ref[...] = jnp.tanh(acc_ref[...] + b_ref[...]).astype(o_ref.dtype)


def mlp_layer_forward(features, weight, bias, *, tm=128, tn=128, tk=128):
    """JAX/Pallas equivalent of MLPLayer.forward.

    features: (..., in_features)
    weight:   (out_features, in_features)   -- torch nn.Linear layout
    bias:     (out_features,)
    returns:  (..., out_features) = tanh(features @ weight.T + bias)
    """
    orig_shape = features.shape
    in_features = orig_shape[-1]
    out_features = weight.shape[0]

    x = features.reshape(-1, in_features).astype(jnp.float32)   # (M, K)
    w = weight.T.astype(jnp.float32)                            # (K, N)
    b = bias.reshape(1, out_features).astype(jnp.float32)       # (1, N)

    M, K = x.shape
    N = out_features

    # Pad to 128-aligned lane-dense tiles; zero-padding along K is exact for the
    # matmul, padded M/N rows/cols are sliced off below.
    Mp, Kp, Np = _round_up(M, tm), _round_up(K, tk), _round_up(N, tn)
    x_p = jnp.pad(x, ((0, Mp - M), (0, Kp - K)))
    w_p = jnp.pad(w, ((0, Kp - K), (0, Np - N)))
    b_p = jnp.pad(b, ((0, 0), (0, Np - N)))

    grid = (Mp // tm, Np // tn, Kp // tk)

    cost = pl.CostEstimate(
        flops=2 * Mp * Kp * Np,
        transcendentals=Mp * Np,
        bytes_accessed=4 * (Mp * Kp + Kp * Np + Mp * Np + Np),
    )

    out_p = pl.pallas_call(
        _mlp_kernel,
        out_shape=jax.ShapeDtypeStruct((Mp, Np), jnp.float32),
        grid_spec=pltpu.PrefetchScalarGridSpec(
            num_scalar_prefetch=0,
            grid=grid,
            in_specs=[
                pl.BlockSpec((tm, tk), lambda i, j, k: (i, k)),   # x tile
                pl.BlockSpec((tk, tn), lambda i, j, k: (k, j)),   # W tile
                pl.BlockSpec((1, tn), lambda i, j, k: (0, j)),    # bias tile
            ],
            out_specs=pl.BlockSpec((tm, tn), lambda i, j, k: (i, j)),
            scratch_shapes=[pltpu.VMEM((tm, tn), jnp.float32)],
        ),
        compiler_params=pltpu.CompilerParams(
            dimension_semantics=("parallel", "parallel", "arbitrary"),
        ),
        cost_estimate=cost,
    )(x_p, w_p, b_p)

    out = out_p[:M, :N]
    return out.reshape(*orig_shape[:-1], out_features)


def _reference(features, weight, bias):
    """Pure-JAX reference matching the torch forward."""
    return jnp.tanh(features @ weight.T + bias)


if __name__ == "__main__":
    # Small shapes consistent with the module (CLS-head MLP over hidden states).
    batch, seq, hidden = 2, 8, 32

    key = jax.random.PRNGKey(0)
    k_x, k_w, k_b = jax.random.split(key, 3)

    # Deterministic nn.Linear-style init (uniform +-1/sqrt(hidden)).
    bound = 1.0 / np.sqrt(hidden)
    features = jax.random.normal(k_x, (batch, seq, hidden), jnp.float32)
    weight = jax.random.uniform(k_w, (hidden, hidden), jnp.float32, -bound, bound)
    bias = jax.random.uniform(k_b, (hidden,), jnp.float32, -bound, bound)

    out = mlp_layer_forward(features, weight, bias)
    out = jax.block_until_ready(out)

    ref = _reference(features, weight, bias)
    np.testing.assert_allclose(np.array(out), np.array(ref), rtol=1e-5, atol=1e-5)

    assert out.shape == (batch, seq, hidden)
    assert not bool(jnp.isnan(out).any())
    print("KERNEL_OK")
</pallas_src>

<mosaic_0001>
module attributes {stable_mosaic.version = 11 : i64} {
  func.func @_mlp_kernel(%arg0: i32, %arg1: i32, %arg2: i32, %arg3: memref<128x128xf32, #tpu.memory_space<vmem>>, %arg4: memref<128x128xf32, #tpu.memory_space<vmem>>, %arg5: memref<1x128xf32, #tpu.memory_space<vmem>>, %arg6: memref<128x128xf32, #tpu.memory_space<vmem>>, %arg7: memref<128x128xf32, #tpu.memory_space<vmem>>) attributes {dimension_semantics = [#tpu.dimension_semantics<parallel>, #tpu.dimension_semantics<parallel>, #tpu.dimension_semantics<arbitrary>], iteration_bounds = array<i64: 1, 1, 1>, scalar_prefetch = 0 : i64, scratch_operands = 1 : i64, tpu.core_type = #tpu.core_type<tc>, window_params = [{transform_indices = @transform_0, window_bounds = array<i64: 128, 128>}, {transform_indices = @transform_1, window_bounds = array<i64: 128, 128>}, {transform_indices = @transform_2, window_bounds = array<i64: 1, 128>}, {transform_indices = @transform_3, window_bounds = array<i64: 128, 128>}]} {
    %c0_i32 = arith.constant 0 : i32
    %0 = arith.cmpi eq, %arg2, %c0_i32 : i32
    %1 = arith.extui %0 : i1 to i32
    %c0_i32_0 = arith.constant 0 : i32
    %2 = arith.cmpi ne, %1, %c0_i32_0 : i32
    scf.if %2 {
      %cst_10 = arith.constant 0.000000e+00 : f32
      %12 = vector.broadcast %cst_10 : f32 to vector<128x128xf32>
      %c0_11 = arith.constant 0 : index
      %c0_12 = arith.constant 0 : index
      %13 = vector.load %arg7[%c0_11, %c0_12] : memref<128x128xf32, #tpu.memory_space<vmem>>, vector<128x128xf32>
      tpu.vector_store %arg7[%c0_11, %c0_12], %12 {strides = array<i32>} : memref<128x128xf32, #tpu.memory_space<vmem>>, vector<128x128xf32>,
    } else {
    }
    %c0 = arith.constant 0 : index
    %c0_1 = arith.constant 0 : index
    %3 = vector.load %arg7[%c0, %c0_1] : memref<128x128xf32, #tpu.memory_space<vmem>>, vector<128x128xf32>
    %c0_2 = arith.constant 0 : index
    %c0_3 = arith.constant 0 : index
    %4 = vector.load %arg3[%c0_2, %c0_3] : memref<128x128xf32, #tpu.memory_space<vmem>>, vector<128x128xf32>
    %c0_4 = arith.constant 0 : index
    %c0_5 = arith.constant 0 : index
    %5 = vector.load %arg4[%c0_4, %c0_5] : memref<128x128xf32, #tpu.memory_space<vmem>>, vector<128x128xf32>
    %cst = arith.constant dense<0.000000e+00> : vector<128x128xf32>
    %6 = tpu.matmul %4, %5, %cst {dimension_numbers = #tpu.dot_dimension_numbers<[1], [0], [0], [1], [0, 0, 1, 1], [], []>} : vector<128x128xf32>, vector<128x128xf32>, vector<128x128xf32> -> vector<128x128xf32>
    %7 = arith.addf %3, %6 : vector<128x128xf32>
    %c0_6 = arith.constant 0 : index
    %c0_7 = arith.constant 0 : index
    %8 = vector.load %arg7[%c0_6, %c0_7] : memref<128x128xf32, #tpu.memory_space<vmem>>, vector<128x128xf32>
    tpu.vector_store %arg7[%c0_6, %c0_7], %7 {strides = array<i32>} : memref<128x128xf32, #tpu.memory_space<vmem>>, vector<128x128xf32>,
    %c0_i32_8 = arith.constant 0 : i32
    %9 = arith.cmpi eq, %arg2, %c0_i32_8 : i32
    %10 = arith.extui %9 : i1 to i32
    %c0_i32_9 = arith.constant 0 : i32
    %11 = arith.cmpi ne, %10, %c0_i32_9 : i32
    scf.if %11 {
      %c0_10 = arith.constant 0 : index
      %c0_11 = arith.constant 0 : index
      %12 = vector.load %arg7[%c0_10, %c0_11] : memref<128x128xf32, #tpu.memory_space<vmem>>, vector<128x128xf32>
      %c0_12 = arith.constant 0 : index
      %c0_13 = arith.constant 0 : index
      %13 = vector.load %arg5[%c0_12, %c0_13] : memref<1x128xf32, #tpu.memory_space<vmem>>, vector<1x128xf32>
      %14 = vector.broadcast %13 : vector<1x128xf32> to vector<128x128xf32>
      %15 = arith.addf %12, %14 : vector<128x128xf32>
      %16 = math.tanh %15 : vector<128x128xf32>
      %c0_14 = arith.constant 0 : index
      %c0_15 = arith.constant 0 : index
      %17 = vector.load %arg6[%c0_14, %c0_15] : memref<128x128xf32, #tpu.memory_space<vmem>>, vector<128x128xf32>
      tpu.vector_store %arg6[%c0_14, %c0_15], %16 {strides = array<i32>} : memref<128x128xf32, #tpu.memory_space<vmem>>, vector<128x128xf32>,
    } else {
    }
    return
  }
  func.func @transform_0(%arg0: i32, %arg1: i32, %arg2: i32) -> (i32, i32) {
    %c0_i32 = arith.constant 0 : i32
    return %arg0, %arg2 : i32, i32
  }
  func.func @transform_1(%arg0: i32, %arg1: i32, %arg2: i32) -> (i32, i32) {
    %c0_i32 = arith.constant 0 : i32
    return %arg2, %arg1 : i32, i32
  }
  func.func @transform_2(%arg0: i32, %arg1: i32, %arg2: i32) -> (i32, i32) {
    %c0_i32 = arith.constant 0 : i32
    %c0_i32_0 = arith.constant 0 : i32
    return %c0_i32, %arg1 : i32, i32
  }
  func.func @transform_3(%arg0: i32, %arg1: i32, %arg2: i32) -> (i32, i32) {
    %c0_i32 = arith.constant 0 : i32
    return %arg0, %arg1 : i32, i32
  }
}

</mosaic_0001>

<bundles_post_ra>
// kernel: tpu_custom_call.1
= control target key start
LH: loop header
LB: loop body
LE: loop exit
PB: predicated region body
PF: predicated region fallthrough
CT: control target
= control target key end

     0   :  { %8 = vsyncpa [#allocation4], 0  ;;  %s699_s0 = inlined_call_operand.hbm [shape: f32[128,128], index: 0, kind: input, shape index: {}]   ;;  %s700_s1 = inlined_call_operand.hbm [shape: f32[128,128], index: 1, kind: input, shape index: {}]   ;;  %s701_s2 = inlined_call_operand.vmem [shape: f32[1,128], index: 2, kind: input, shape index: {}]   ;;  %s702_s3 = inlined_call_operand.hbm [shape: f32[128,128], index: 3, kind: output, shape index: {}]  }
   0x1   :  { %9 = vsyncpa [#allocation7], 0 }
   0x2   :  { %10 = vsyncpa [#allocation5], 0  ;;  %s626_s12 = smov [#allocation3]   ;;  %s554_s16 = scalar_lea.hbm %s699_s0, 2048 }
   0x3   :  { %s16_s13 = sshll.u32 %s626_s12, 4  ;;  %p555_p0 = scmp.ne.s32.totalorder %s699_s0, %s554_s16  ;;  %s17_s13 = int_to_ptr.vmem [resolvable:$true] %s16_s13 }
   0x4   :  { %p558_p1 = scmp.lt.u32.totalorder %s554_s16, %s699_s0 }
   0x6   :  { %p560_p2 = pnand %p558_p1, %p555_p0 }
   0x8   :  { %563 = shalt.err (!%p560_p2)
}
   0x9   :  { %s564_s21 = scalar_lea.vmem %s17_s13, 2048  ;;  %p569_p4 = scmp.lt.s32.totalorder %s17_s13, %s17_s13 }
   0xa   :  { %p565_p3 = scmp.ne.s32.totalorder %s17_s13, %s564_s21  ;;  %p570_p5 = scmp.lt.s32.totalorder %s564_s21, %s564_s21 }
   0xc   :  { %p571_p6 = por %p570_p5, %p569_p4 }
   0xe   :  { %p572_p7 = pnand %p571_p6, %p565_p3 }
  0x10   :  { %575 = shalt.err (!%p572_p7)
}
  0x11   :  { %s627_s22 = smov 128   ;;  %s628_s23 = smov 8  }
  0x12   :  { %22 = dma.hbm_to_vmem [thread:$0]  %s699_s0, 2048, %s17_s13, [#allocation4], %s627_s22, %s627_s22, %s628_s23  }
  0x13   :  { %s629_s26 = smov [#allocation6]   ;;  %s576_s30 = scalar_lea.hbm %s700_s1, 2048 }
  0x14   :  { %s28_s27 = sshll.u32 %s629_s26, 4  ;;  %p577_p8 = scmp.ne.s32.totalorder %s700_s1, %s576_s30  ;;  %s29_s27 = int_to_ptr.vmem [resolvable:$true] %s28_s27 }
  0x15   :  { %p580_p9 = scmp.lt.u32.totalorder %s576_s30, %s700_s1 }
  0x17   :  { %p582_p10 = pnand %p580_p9, %p577_p8 }
  0x19   :  { %585 = shalt.err (!%p582_p10)
}
  0x1a   :  { %s586_s8 = scalar_lea.vmem %s29_s27, 2048  ;;  %p591_p12 = scmp.lt.s32.totalorder %s29_s27, %s29_s27 }
  0x1b   :  { %p587_p11 = scmp.ne.s32.totalorder %s29_s27, %s586_s8  ;;  %p592_p13 = scmp.lt.s32.totalorder %s586_s8, %s586_s8 }
  0x1d   :  { %p593_p0 = por %p592_p13, %p591_p12 }
  0x1f   :  { %p594_p1 = pnand %p593_p0, %p587_p11 }
  0x21   :  { %597 = shalt.err (!%p594_p1)
}
  0x22   :  { %34 = dma.hbm_to_vmem [thread:$0]  %s700_s1, 2048, %s29_s27, [#allocation7], %s627_s22, %s627_s22, %s628_s23  }
  0x23   :  { %620 = dma.done.wait [#allocation4], 2048  }
  0x24   :  { %621 = vsyncadd [#allocation4], 4294965248 }
  0x25   :  { %622 = dma.done.wait [#allocation7], 2048  }
  0x26   :  { %623 = vsyncadd [#allocation7], 4294965248  ;;  %v95_v0 = vld [vmem:[#allocation6] sm:$0xff]  ;;  %v96_v1 = vld [vmem:[#allocation6 + $0x8] sm:$0xff] }
  0x27   :  { %v97_v2 = vld [vmem:[#allocation6 + $0x10] sm:$0xff]  ;;  %v469_v3 = vpack.c.bf16 %v96_v1, %v95_v0  ;;  %v98_v4 = vld [vmem:[#allocation6 + $0x18] sm:$0xff]  ;;  %v99_v6 = vld [vmem:[#allocation6 + $0x20] sm:$0xff] }
  0x28   :  { %v473_v5 = vpack.c.bf16 %v98_v4, %v97_v2  ;;  %v100_v7 = vld [vmem:[#allocation6 + $0x28] sm:$0xff]  ;;  %v79_v9 = vld [vmem:[#allocation3] sm:$0xff]  ;;  %v101_v11 = vld [vmem:[#allocation6 + $0x30] sm:$0xff] }
  0x29   :  { %470 = vmatprep.subr.bf16.mxu0 %v469_v3  ;;  %501 = vmatprep.subr.bf16.mxu1 %v469_v3  ;;  %v477_v8 = vpack.c.bf16 %v100_v7, %v99_v6  ;;  %v87_v10 = vld [vmem:[#allocation3 + $0x40] sm:$0xff]  ;;  %v102_v12 = vld [vmem:[#allocation6 + $0x38] sm:$0xff]  ;;  %v104_v15 = vld [vmem:[#allocation6 + $0x48] sm:$0xff] }
  0x2a   :  { %472 = vmatpush3.bf16.msra.mxu0 %v469_v3  ;;  %509 = vmatpush3.bf16.msra.mxu1 %v469_v3  ;;  %v481_v13 = vpack.c.bf16 %v102_v12, %v101_v11  ;;  %v103_v14 = vld [vmem:[#allocation6 + $0x40] sm:$0xff]  ;;  %v105_v17 = vld [vmem:[#allocation6 + $0x50] sm:$0xff]  ;;  %v106_v18 = vld [vmem:[#allocation6 + $0x58] sm:$0xff] }
  0x2b   :  { %474 = vmatprep.subr.bf16.mxu0 %v473_v5  ;;  %502 = vmatprep.subr.bf16.mxu1 %v473_v5  ;;  %v485_v16 = vpack.c.bf16 %v104_v15, %v103_v14  ;;  %v489_v19 = vpack.c.bf16 %v106_v18, %v105_v17  ;;  %v107_v20 = vld [vmem:[#allocation6 + $0x60] sm:$0xff]  ;;  %v108_v21 = vld [vmem:[#allocation6 + $0x68] sm:$0xff]  ;;  %v109_v23 = vld [vmem:[#allocation6 + $0x70] sm:$0xff] }
  0x2c   :  { %445 = vmatprep.mubr.f32.mxu0 %v79_v9  ;;  %457 = vmatprep.mubr.f32.mxu1 %v87_v10  ;;  %v493_v22 = vpack.c.bf16 %v108_v21, %v107_v20  ;;  %v110_v24 = vld [vmem:[#allocation6 + $0x78] sm:$0xff]  ;;  %v80_v26 = vld [vmem:[#allocation3 + $0x8] sm:$0xff]  ;;  %v81_v28 = vld [vmem:[#allocation3 + $0x10] sm:$0xff] }
  0x2d   :  { %v497_v25 = vpack.c.bf16 %v110_v24, %v109_v23  ;;  %v88_v27 = vld [vmem:[#allocation3 + $0x48] sm:$0xff]  ;;  %v89_v29 = vld [vmem:[#allocation3 + $0x50] sm:$0xff]  ;;  %v82_v30 = vld [vmem:[#allocation3 + $0x18] sm:$0xff] }
  0x2e   :  { %476 = vmatpush3.bf16.msra.mxu0 %v473_v5  ;;  %510 = vmatpush3.bf16.msra.mxu1 %v473_v5  ;;  %v90_v31 = vld [vmem:[#allocation3 + $0x58] sm:$0xff]  ;;  %v83_v32 = vld [vmem:[#allocation3 + $0x20] sm:$0xff]  ;;  %v84_v34 = vld [vmem:[#allocation3 + $0x28] sm:$0xff] }
  0x2f   :  { %478 = vmatprep.subr.bf16.mxu0 %v477_v8  ;;  %503 = vmatprep.subr.bf16.mxu1 %v477_v8  ;;  %v91_v33 = vld [vmem:[#allocation3 + $0x60] sm:$0xff]  ;;  %v92_v35 = vld [vmem:[#allocation3 + $0x68] sm:$0xff]  ;;  %v85_v36 = vld [vmem:[#allocation3 + $0x30] sm:$0xff] }
  0x30   :  { %v93_v37 = vld [vmem:[#allocation3 + $0x70] sm:$0xff]  ;;  %v86_v38 = vld [vmem:[#allocation3 + $0x38] sm:$0xff]  ;;  %v380_v40 = vld [vmem:[%s701_s2] ss:$0 sm:$0xff]  ;;  %s630_s2 = smov [#allocation8]  }
  0x31   :  { %v94_v39 = vld [vmem:[#allocation3 + $0x78] sm:$0xff]  ;;  %s367_s11 = sshll.u32 %s630_s2, 4  ;;  %s368_s11 = int_to_ptr.vmem [resolvable:$true] %s367_s11 }
  0x32   :  { %480 = vmatpush3.bf16.msra.mxu0 %v477_v8  ;;  %511 = vmatpush3.bf16.msra.mxu1 %v477_v8  ;;  %s598_s12 = scalar_lea.vmem %s368_s11, 2048  ;;  %p603_p3 = scmp.lt.s32.totalorder %s368_s11, %s368_s11 }
  0x33   :  { %482 = vmatprep.subr.bf16.mxu0 %v481_v13  ;;  %504 = vmatprep.subr.bf16.mxu1 %v481_v13  ;;  %p599_p2 = scmp.ne.s32.totalorder %s368_s11, %s598_s12  ;;  %p604_p4 = scmp.lt.s32.totalorder %s598_s12, %s598_s12 }
  0x35   :  { %p605_p5 = por %p604_p4, %p603_p3 }
  0x36   :  { %484 = vmatpush3.bf16.msra.mxu0 %v481_v13  ;;  %512 = vmatpush3.bf16.msra.mxu1 %v481_v13 }
  0x37   :  { %486 = vmatprep.subr.bf16.mxu0 %v485_v16  ;;  %505 = vmatprep.subr.bf16.mxu1 %v485_v16  ;;  %p606_p6 = pnand %p605_p5, %p599_p2 }
  0x3a   :  { %488 = vmatpush3.bf16.msra.mxu0 %v485_v16  ;;  %513 = vmatpush3.bf16.msra.mxu1 %v485_v16 }
  0x3b   :  { %490 = vmatprep.subr.bf16.mxu0 %v489_v19  ;;  %506 = vmatprep.subr.bf16.mxu1 %v489_v19 }
  0x3e   :  { %492 = vmatpush3.bf16.msra.mxu0 %v489_v19  ;;  %514 = vmatpush3.bf16.msra.mxu1 %v489_v19 }
  0x3f   :  { %494 = vmatprep.subr.bf16.mxu0 %v493_v22  ;;  %507 = vmatprep.subr.bf16.mxu1 %v493_v22 }
  0x42   :  { %496 = vmatpush3.bf16.msra.mxu0 %v493_v22  ;;  %515 = vmatpush3.bf16.msra.mxu1 %v493_v22 }
  0x43   :  { %498 = vmatprep.subr.bf16.mxu0 %v497_v25  ;;  %508 = vmatprep.subr.bf16.mxu1 %v497_v25 }
  0x46   :  { %500 = vmatpush3.bf16.msra.mxu0 %v497_v25  ;;  %516 = vmatpush3.bf16.msra.mxu1 %v497_v25 }
  0x49   :  { %446 = vmatmul.mubr.f32.vlgmr.msra.gmra.mrb[0].mxu0 %v80_v26  ;;  %458 = vmatmul.mubr.f32.vlgmr.msra.gmra.mrb[0].mxu1 %v88_v27 }
  0x4a   :  { %448 = vmatprep.mubr.f32.mxu0 %v81_v28  ;;  %460 = vmatprep.mubr.f32.mxu1 %v89_v29 }
  0x4d   :  { %449 = vmatmul.mubr.f32.gmra.mrb[2].mxu0 %v82_v30  ;;  %461 = vmatmul.mubr.f32.gmra.mrb[2].mxu1 %v90_v31 }
  0x4e   :  { %451 = vmatprep.mubr.f32.mxu0 %v83_v32  ;;  %463 = vmatprep.mubr.f32.mxu1 %v91_v33 }
  0x51   :  { %452 = vmatmul.mubr.f32.gmra.mrb[4].mxu0 %v84_v34  ;;  %464 = vmatmul.mubr.f32.gmra.mrb[4].mxu1 %v92_v35 }
  0x52   :  { %454 = vmatprep.mubr.f32.mxu0 %v85_v36  ;;  %466 = vmatprep.mubr.f32.mxu1 %v93_v37 }
  0x55   :  { %455 = vmatmul.mubr.f32.gmra.mrb[6].mxu0 %v86_v38  ;;  %467 = vmatmul.mubr.f32.gmra.mrb[6].mxu1 %v94_v39 }
 0x11c   :  { %v447_v41 = vpop.f32.mrb[0].mxu0  ;;  %v459_v42 = vpop.f32.mrb[0].mxu1 }
 0x11d   :  { %v315_v43 = vadd.f32 %v447_v41, %v380_v40  ;;  %v323_v44 = vadd.f32 %v459_v42, %v380_v40  ;;  %v177_v45 = vpop.f32.mrb[1].mxu0  ;;  %v217_v46 = vpop.f32.mrb[1].mxu1 }
 0x11e   :  { %v314_v47 = vadd.f32 %v380_v40, %v177_v45  ;;  %v322_v48 = vadd.f32 %v380_v40, %v217_v46 }
 0x11f   :  { %522 = vtanh.f32 %v315_v43 }
 0x120   :  { %524 = vtanh.f32 %v323_v44  ;;  %v450_v49 = vpop.f32.mrb[2].mxu0  ;;  %v462_v50 = vpop.f32.mrb[2].mxu1 }
 0x121   :  { %526 = vtanh.f32 %v314_v47  ;;  %v317_v51 = vadd.f32 %v450_v49, %v380_v40  ;;  %v325_v52 = vadd.f32 %v462_v50, %v380_v40  ;;  %v187_v53 = vpop.f32.mrb[3].mxu0  ;;  %v227_v54 = vpop.f32.mrb[3].mxu1 }
 0x122   :  { %528 = vtanh.f32 %v322_v48  ;;  %v316_v55 = vadd.f32 %v380_v40, %v187_v53  ;;  %v324_v56 = vadd.f32 %v380_v40, %v227_v54 }
 0x123   :  { %530 = vtanh.f32 %v317_v51 }
 0x124   :  { %532 = vtanh.f32 %v325_v52  ;;  %v453_v57 = vpop.f32.mrb[4].mxu0  ;;  %v465_v58 = vpop.f32.mrb[4].mxu1 }
 0x125   :  { %534 = vtanh.f32 %v316_v55  ;;  %v319_v59 = vadd.f32 %v453_v57, %v380_v40  ;;  %v327_v60 = vadd.f32 %v465_v58, %v380_v40  ;;  %v197_v61 = vpop.f32.mrb[5].mxu0  ;;  %v237_v62 = vpop.f32.mrb[5].mxu1 }
 0x126   :  { %536 = vtanh.f32 %v324_v56  ;;  %v318_v63 = vadd.f32 %v380_v40, %v197_v61  ;;  %v326_v0 = vadd.f32 %v380_v40, %v237_v62 }
 0x127   :  { %538 = vtanh.f32 %v319_v59 }
 0x128   :  { %540 = vtanh.f32 %v327_v60  ;;  %v456_v1 = vpop.f32.mrb[6].mxu0  ;;  %v468_v2 = vpop.f32.mrb[6].mxu1 }
 0x129   :  { %v523_v3 = vpop.eup %522  ;;  %542 = vtanh.f32 %v318_v63  ;;  %v321_v4 = vadd.f32 %v456_v1, %v380_v40  ;;  %v329_v5 = vadd.f32 %v468_v2, %v380_v40  ;;  %v207_v6 = vpop.f32.mrb[7].mxu0 }
 0x12a   :  { %v247_v7 = vpop.f32.mrb[7].mxu1  ;;  %v525_v8 = vpop.eup %524  ;;  %347 = vst [vmem:[#allocation8 + $0x8] sm:$0xff] %v523_v3  ;;  %544 = vtanh.f32 %v326_v0  ;;  %v320_v9 = vadd.f32 %v380_v40, %v207_v6 }
 0x12b   :  { %v328_v10 = vadd.f32 %v380_v40, %v247_v7  ;;  %v527_v11 = vpop.eup %526  ;;  %355 = vst [vmem:[#allocation8 + $0x48] sm:$0xff] %v525_v8  ;;  %546 = vtanh.f32 %v321_v4 }
 0x12c   :  { %v529_v12 = vpop.eup %528  ;;  %346 = vst [vmem:[#allocation8] sm:$0xff] %v527_v11  ;;  %548 = vtanh.f32 %v329_v5 }
 0x12d   :  { %v531_v13 = vpop.eup %530  ;;  %354 = vst [vmem:[#allocation8 + $0x40] sm:$0xff] %v529_v12  ;;  %550 = vtanh.f32 %v320_v9 }
 0x12e   :  { %v533_v14 = vpop.eup %532  ;;  %349 = vst [vmem:[#allocation8 + $0x18] sm:$0xff] %v531_v13  ;;  %552 = vtanh.f32 %v328_v10 }
 0x12f   :  { %v535_v15 = vpop.eup %534  ;;  %357 = vst [vmem:[#allocation8 + $0x58] sm:$0xff] %v533_v14 }
 0x130   :  { %v537_v16 = vpop.eup %536  ;;  %348 = vst [vmem:[#allocation8 + $0x10] sm:$0xff] %v535_v15 }
 0x131   :  { %v539_v17 = vpop.eup %538  ;;  %356 = vst [vmem:[#allocation8 + $0x50] sm:$0xff] %v537_v16 }
 0x132   :  { %v541_v18 = vpop.eup %540  ;;  %351 = vst [vmem:[#allocation8 + $0x28] sm:$0xff] %v539_v17 }
 0x133   :  { %v543_v19 = vpop.eup %542  ;;  %359 = vst [vmem:[#allocation8 + $0x68] sm:$0xff] %v541_v18 }
 0x134   :  { %v545_v20 = vpop.eup %544  ;;  %350 = vst [vmem:[#allocation8 + $0x20] sm:$0xff] %v543_v19 }
 0x135   :  { %v547_v21 = vpop.eup %546  ;;  %358 = vst [vmem:[#allocation8 + $0x60] sm:$0xff] %v545_v20 }
 0x136   :  { %v549_v22 = vpop.eup %548  ;;  %353 = vst [vmem:[#allocation8 + $0x38] sm:$0xff] %v547_v21 }
 0x137   :  { %v551_v23 = vpop.eup %550  ;;  %361 = vst [vmem:[#allocation8 + $0x78] sm:$0xff] %v549_v22 }
 0x138   :  { %v553_v24 = vpop.eup %552  ;;  %352 = vst [vmem:[#allocation8 + $0x30] sm:$0xff] %v551_v23 }
 0x139   :  { %360 = vst [vmem:[#allocation8 + $0x70] sm:$0xff] %v553_v24 }
 0x13a   :  { %609 = shalt.err (!%p606_p6)
}
 0x13b   :  { %s610_s15 = scalar_lea.hbm %s702_s3, 2048 }
 0x13c   :  { %p611_p7 = scmp.ne.s32.totalorder %s702_s3, %s610_s15  ;;  %p614_p8 = scmp.lt.u32.totalorder %s610_s15, %s702_s3 }
 0x13e   :  { %p616_p9 = pnand %p614_p8, %p611_p7 }
 0x140   :  { %619 = shalt.err (!%p616_p9)
}
 0x141   :  { %373 = dma.vmem_to_hbm [thread:$0]  %s368_s11, 2048, %s702_s3, [#allocation5], %s627_s22, %s627_s22, %s628_s23  }
 0x142   :  { %624 = dma.done.wait [#allocation5], 2048  }
 0x143   :  { %625 = vsyncadd [#allocation5], 4294965248 }
 0x144   :  { %377 = vsyncpa [#allocation4], 1 }
 0x145   :  { %378 = vsyncpa [#allocation7], 1 }
 0x146   :  { %379 = vsyncpa [#allocation5], 1 }

</bundles_post_ra>
